<compile_context>
chip_gen: v7x
topology: tpu7x:2x2x1
jax: 0.10.0
libtpu: 0.0.40
codegen_flags: <defaults>
</compile_context>

<pallas_src>
import math

import jax
import jax.numpy as jnp
import numpy as np
from jax.experimental import pallas as pl
from jax.experimental.pallas import tpu as pltpu

# ---------------------------------------------------------------------------
# Problem sizes (small, consistent with the module)
# ---------------------------------------------------------------------------
BATCH = 64
BLOCK_B = 32                      # batch rows per grid step
INPUT_SIZE = 16
HIDDEN_SIZE = 32
OUTPUT_SIZE = 2                   # must be 2: covariance is hard-coded 2x2
OUT_LANES = 128                   # lane-dense combined output width

# Fixed covariance of the MultivariateNormal -> compile-time constants
_COV = np.array([[0.2, 0.1], [0.1, 0.2]], dtype=np.float64)
_L = np.linalg.cholesky(_COV)                   # lower-triangular scale
_L00 = float(_L[0, 0])
_L10 = float(_L[1, 0])
_L11 = float(_L[1, 1])
_LOGDET = float(np.log(np.linalg.det(_COV)))    # log|cov|
_LOG2PI = float(math.log(2.0 * math.pi))
_K = float(OUTPUT_SIZE)


# ---------------------------------------------------------------------------
# Pallas kernel: MLP + tanh + reparameterised MVN sample + log-prob
# ---------------------------------------------------------------------------
def policy_kernel(x_ref, w1_ref, b1_ref, w2_ref, b2_ref, z_ref, out_ref):
    # Layer 1 (MXU): Linear + Tanh
    x = x_ref[...]                                             # (bb, in)
    h = jnp.dot(x, w1_ref[...], preferred_element_type=jnp.float32)
    h = jnp.tanh(h + b1_ref[...])                              # (bb, hidden)

    # Layer 2 (VPU + lane reduce): hidden -> 2 outputs.  A (bb,32)@(32,2)
    # matmul would use 2 of the MXU result lanes; two multiply+reduce ops
    # overlap with the tanh (EUP slot) and skip the MXU result-FIFO drain.
    w2 = w2_ref[...]                                           # (2, hidden)
    b2 = b2_ref[...]                                           # (1, 2)
    m0 = jnp.sum(h * w2[0:1, :], axis=-1, keepdims=True)       # (bb, 1)
    m1 = jnp.sum(h * w2[1:2, :], axis=-1, keepdims=True)       # (bb, 1)
    mean0 = jnp.tanh(m0 + b2[:, 0:1]) * 0.5
    mean1 = jnp.tanh(m1 + b2[:, 1:2]) * 0.5

    # Reparameterised sample: action = mean + L @ z  (2x2 L baked in, VPU only)
    z = z_ref[...]                                             # (bb, 2)
    z0 = z[:, 0:1]
    z1 = z[:, 1:2]
    a0 = mean0 + _L00 * z0
    a1 = mean1 + _L10 * z0 + _L11 * z1

    # log_prob under MVN(mean, cov):
    #   (action-mean)^T S^-1 (action-mean) == z^T (L^T S^-1 L) z == z.z
    quad = z0 * z0 + z1 * z1                                   # (bb, 1)
    logp = -0.5 * (quad + _LOGDET + _K * _LOG2PI)              # (bb, 1)

    # Single lane-dense output: col 0/1 = actions, col 2 = log_prob, rest 0.
    col = jax.lax.broadcasted_iota(jnp.int32, out_ref.shape, 1)
    out_ref[...] = jnp.where(
        col == 0, a0,
        jnp.where(col == 1, a1,
                  jnp.where(col == 2, logp, 0.0)))


def policy_forward(x, w1, b1, w2, b2, z, *, block_b=BLOCK_B):
    """x: (B, input) f32, z: (B, 2) standard-normal noise.
    Returns (actions (B, 2), log_probs (B,))."""
    b = x.shape[0]
    assert b % block_b == 0, "batch must be a multiple of the block size"
    grid = (b // block_b,)

    out = pl.pallas_call(
        policy_kernel,
        grid=grid,
        in_specs=[
            pl.BlockSpec((block_b, INPUT_SIZE), lambda i: (i, 0)),       # x
            pl.BlockSpec((INPUT_SIZE, HIDDEN_SIZE), lambda i: (0, 0)),   # w1
            pl.BlockSpec((1, HIDDEN_SIZE), lambda i: (0, 0)),            # b1
            pl.BlockSpec((OUTPUT_SIZE, HIDDEN_SIZE), lambda i: (0, 0)),  # w2
            pl.BlockSpec((1, OUTPUT_SIZE), lambda i: (0, 0)),            # b2
            pl.BlockSpec((block_b, OUTPUT_SIZE), lambda i: (i, 0)),      # z
        ],
        out_specs=pl.BlockSpec((block_b, OUT_LANES), lambda i: (i, 0)),
        out_shape=jax.ShapeDtypeStruct((b, OUT_LANES), jnp.float32),
        compiler_params=pltpu.CompilerParams(
            dimension_semantics=("parallel",)),
    )(x, w1, b1, w2, b2, z)

    actions = out[:, :OUTPUT_SIZE]
    log_probs = out[:, OUTPUT_SIZE]
    return actions, log_probs


# ---------------------------------------------------------------------------
# Deterministic parameter init (PyTorch Linear-style uniform bounds)
# ---------------------------------------------------------------------------
def init_params(key):
    k1, k2, k3, k4 = jax.random.split(key, 4)
    bound1 = 1.0 / math.sqrt(INPUT_SIZE)
    bound2 = 1.0 / math.sqrt(HIDDEN_SIZE)
    # w1 stored pre-transposed (in, out) so the kernel does x @ w1 on the MXU;
    # w2 stored in native PyTorch (out, in) layout for the VPU row-broadcast.
    w1 = jax.random.uniform(k1, (INPUT_SIZE, HIDDEN_SIZE), jnp.float32,
                            -bound1, bound1)
    b1 = jax.random.uniform(k2, (1, HIDDEN_SIZE), jnp.float32, -bound1, bound1)
    w2 = jax.random.uniform(k3, (OUTPUT_SIZE, HIDDEN_SIZE), jnp.float32,
                            -bound2, bound2)
    b2 = jax.random.uniform(k4, (1, OUTPUT_SIZE), jnp.float32, -bound2, bound2)
    return w1, b1, w2, b2


if __name__ == "__main__":
    key = jax.random.PRNGKey(0)
    k_param, k_x, k_eps = jax.random.split(key, 3)

    w1, b1, w2, b2 = init_params(k_param)
    x = jax.random.normal(k_x, (BATCH, INPUT_SIZE), jnp.float32)
    # standard-normal noise for the reparameterised MVN sample
    z = jax.random.normal(k_eps, (BATCH, OUTPUT_SIZE), jnp.float32)

    actions, log_probs = policy_forward(x, w1, b1, w2, b2, z)
    jax.block_until_ready((actions, log_probs))

    # quick sanity check against a pure-JAX reference
    h_ref = jnp.tanh(x @ w1 + b1)
    mean_ref = jnp.tanh(h_ref @ w2.T + b2) * 0.5
    act_ref = mean_ref + z @ jnp.asarray(_L.T, jnp.float32)
    diff = act_ref - mean_ref
    sinv = jnp.asarray(np.linalg.inv(_COV), jnp.float32)
    quad_ref = jnp.sum(diff * (diff @ sinv), axis=-1)
    logp_ref = -0.5 * (quad_ref + _LOGDET + _K * _LOG2PI)
    assert jnp.allclose(actions, act_ref, atol=1e-5)
    assert jnp.allclose(log_probs, logp_ref, atol=1e-5)

    print("KERNEL_OK")
</pallas_src>

<mosaic_0001>
module attributes {stable_mosaic.version = 11 : i64} {
  func.func @policy_kernel(%arg0: i32, %arg1: memref<32x16xf32, #tpu.memory_space<vmem>>, %arg2: memref<16x32xf32, #tpu.memory_space<vmem>>, %arg3: memref<1x32xf32, #tpu.memory_space<vmem>>, %arg4: memref<2x32xf32, #tpu.memory_space<vmem>>, %arg5: memref<1x2xf32, #tpu.memory_space<vmem>>, %arg6: memref<32x2xf32, #tpu.memory_space<vmem>>, %arg7: memref<32x128xf32, #tpu.memory_space<vmem>>) attributes {dimension_semantics = [#tpu.dimension_semantics<parallel>], iteration_bounds = array<i64: 2>, scalar_prefetch = 0 : i64, scratch_operands = 0 : i64, tpu.core_type = #tpu.core_type<tc>, window_params = [{transform_indices = @transform_0, window_bounds = array<i64: 32, 16>}, {pipeline_mode = #tpu.pipeline_mode<synchronous>, transform_indices = @transform_1, window_bounds = array<i64: 16, 32>}, {pipeline_mode = #tpu.pipeline_mode<synchronous>, transform_indices = @transform_2, window_bounds = array<i64: 1, 32>}, {pipeline_mode = #tpu.pipeline_mode<synchronous>, transform_indices = @transform_3, window_bounds = array<i64: 2, 32>}, {pipeline_mode = #tpu.pipeline_mode<synchronous>, transform_indices = @transform_4, window_bounds = array<i64: 1, 2>}, {transform_indices = @transform_5, window_bounds = array<i64: 32, 2>}, {transform_indices = @transform_6, window_bounds = array<i64: 32, 128>}]} {
    %c0 = arith.constant 0 : index
    %c0_0 = arith.constant 0 : index
    %0 = vector.load %arg1[%c0, %c0_0] : memref<32x16xf32, #tpu.memory_space<vmem>>, vector<32x16xf32>
    %c0_1 = arith.constant 0 : index
    %c0_2 = arith.constant 0 : index
    %1 = vector.load %arg2[%c0_1, %c0_2] : memref<16x32xf32, #tpu.memory_space<vmem>>, vector<16x32xf32>
    %cst = arith.constant dense<0.000000e+00> : vector<32x32xf32>
    %2 = tpu.matmul %0, %1, %cst {dimension_numbers = #tpu.dot_dimension_numbers<[1], [0], [0], [1], [0, 0, 1, 1], [], []>} : vector<32x16xf32>, vector<16x32xf32>, vector<32x32xf32> -> vector<32x32xf32>
    %c0_3 = arith.constant 0 : index
    %c0_4 = arith.constant 0 : index
    %3 = vector.load %arg3[%c0_3, %c0_4] : memref<1x32xf32, #tpu.memory_space<vmem>>, vector<1x32xf32>
    %4 = vector.broadcast %3 : vector<1x32xf32> to vector<32x32xf32>
    %5 = arith.addf %2, %4 : vector<32x32xf32>
    %6 = math.tanh %5 : vector<32x32xf32>
    %c0_5 = arith.constant 0 : index
    %c0_6 = arith.constant 0 : index
    %7 = vector.load %arg4[%c0_5, %c0_6] : memref<2x32xf32, #tpu.memory_space<vmem>>, vector<2x32xf32>
    %c0_7 = arith.constant 0 : index
    %c0_8 = arith.constant 0 : index
    %8 = vector.load %arg5[%c0_7, %c0_8] : memref<1x2xf32, #tpu.memory_space<vmem>>, vector<1x2xf32>
    %9 = vector.extract_strided_slice %7 {offsets = [0, 0], sizes = [1, 32], strides = [1, 1]} : vector<2x32xf32> to vector<1x32xf32>
    %10 = vector.broadcast %9 : vector<1x32xf32> to vector<32x32xf32>
    %11 = arith.mulf %6, %10 : vector<32x32xf32>
    %cst_9 = arith.constant dense<0.000000e+00> : vector<32xf32>
    %12 = vector.multi_reduction <add>, %11, %cst_9 [1] : vector<32x32xf32> to vector<32xf32>
    %13 = vector.shape_cast %12 : vector<32xf32> to vector<32x1xf32>
    %14 = vector.extract_strided_slice %7 {offsets = [1, 0], sizes = [1, 32], strides = [1, 1]} : vector<2x32xf32> to vector<1x32xf32>
    %15 = vector.broadcast %14 : vector<1x32xf32> to vector<32x32xf32>
    %16 = arith.mulf %6, %15 : vector<32x32xf32>
    %cst_10 = arith.constant dense<0.000000e+00> : vector<32xf32>
    %17 = vector.multi_reduction <add>, %16, %cst_10 [1] : vector<32x32xf32> to vector<32xf32>
    %18 = vector.shape_cast %17 : vector<32xf32> to vector<32x1xf32>
    %19 = vector.extract_strided_slice %8 {offsets = [0, 0], sizes = [1, 1], strides = [1, 1]} : vector<1x2xf32> to vector<1x1xf32>
    %20 = vector.broadcast %19 : vector<1x1xf32> to vector<32x1xf32>
    %21 = arith.addf %13, %20 : vector<32x1xf32>
    %22 = math.tanh %21 : vector<32x1xf32>
    %cst_11 = arith.constant 5.000000e-01 : f32
    %23 = vector.broadcast %cst_11 : f32 to vector<32x1xf32>
    %24 = arith.mulf %22, %23 : vector<32x1xf32>
    %25 = vector.extract_strided_slice %8 {offsets = [0, 1], sizes = [1, 1], strides = [1, 1]} : vector<1x2xf32> to vector<1x1xf32>
    %26 = vector.broadcast %25 : vector<1x1xf32> to vector<32x1xf32>
    %27 = arith.addf %18, %26 : vector<32x1xf32>
    %28 = math.tanh %27 : vector<32x1xf32>
    %cst_12 = arith.constant 5.000000e-01 : f32
    %29 = vector.broadcast %cst_12 : f32 to vector<32x1xf32>
    %30 = arith.mulf %28, %29 : vector<32x1xf32>
    %c0_13 = arith.constant 0 : index
    %c0_14 = arith.constant 0 : index
    %31 = vector.load %arg6[%c0_13, %c0_14] : memref<32x2xf32, #tpu.memory_space<vmem>>, vector<32x2xf32>
    %32 = vector.extract_strided_slice %31 {offsets = [0, 0], sizes = [32, 1], strides = [1, 1]} : vector<32x2xf32> to vector<32x1xf32>
    %33 = vector.extract_strided_slice %31 {offsets = [0, 1], sizes = [32, 1], strides = [1, 1]} : vector<32x2xf32> to vector<32x1xf32>
    %cst_15 = arith.constant 0.44721359 : f32
    %34 = vector.broadcast %cst_15 : f32 to vector<32x1xf32>
    %35 = arith.mulf %34, %32 : vector<32x1xf32>
    %36 = arith.addf %24, %35 : vector<32x1xf32>
    %cst_16 = arith.constant 0.223606795 : f32
    %37 = vector.broadcast %cst_16 : f32 to vector<32x1xf32>
    %38 = arith.mulf %37, %32 : vector<32x1xf32>
    %39 = arith.addf %30, %38 : vector<32x1xf32>
    %cst_17 = arith.constant 0.387298346 : f32
    %40 = vector.broadcast %cst_17 : f32 to vector<32x1xf32>
    %41 = arith.mulf %40, %33 : vector<32x1xf32>
    %42 = arith.addf %39, %41 : vector<32x1xf32>
    %43 = arith.mulf %32, %32 : vector<32x1xf32>
    %44 = arith.mulf %33, %33 : vector<32x1xf32>
    %45 = arith.addf %43, %44 : vector<32x1xf32>
    %cst_18 = arith.constant -3.50655794 : f32
    %46 = vector.broadcast %cst_18 : f32 to vector<32x1xf32>
    %47 = arith.addf %45, %46 : vector<32x1xf32>
    %cst_19 = arith.constant 3.67575407 : f32
    %48 = vector.broadcast %cst_19 : f32 to vector<32x1xf32>
    %49 = arith.addf %47, %48 : vector<32x1xf32>
    %cst_20 = arith.constant -5.000000e-01 : f32
    %50 = vector.broadcast %cst_20 : f32 to vector<32x1xf32>
    %51 = arith.mulf %50, %49 : vector<32x1xf32>
    %52 = tpu.iota {dimensions = array<i32: 1>} : vector<32x128xi32>
    %c0_i32 = arith.constant 0 : i32
    %53 = vector.broadcast %c0_i32 : i32 to vector<32x128xi32>
    %54 = arith.cmpi eq, %52, %53 : vector<32x128xi32>
    %c1_i32 = arith.constant 1 : i32
    %55 = vector.broadcast %c1_i32 : i32 to vector<32x128xi32>
    %56 = arith.cmpi eq, %52, %55 : vector<32x128xi32>
    %c2_i32 = arith.constant 2 : i32
    %57 = vector.broadcast %c2_i32 : i32 to vector<32x128xi32>
    %58 = arith.cmpi eq, %52, %57 : vector<32x128xi32>
    %cst_21 = arith.constant 0.000000e+00 : f32
    %59 = vector.shape_cast %51 : vector<32x1xf32> to vector<32x1xf32>
    %60 = vector.broadcast %59 : vector<32x1xf32> to vector<32x128xf32>
    %61 = vector.broadcast %cst_21 : f32 to vector<32x128xf32>
    %62 = arith.select %58, %60, %61 : vector<32x128xi1>, vector<32x128xf32>
    %63 = vector.shape_cast %42 : vector<32x1xf32> to vector<32x1xf32>
    %64 = vector.broadcast %63 : vector<32x1xf32> to vector<32x128xf32>
    %65 = arith.select %56, %64, %62 : vector<32x128xi1>, vector<32x128xf32>
    %66 = vector.shape_cast %36 : vector<32x1xf32> to vector<32x1xf32>
    %67 = vector.broadcast %66 : vector<32x1xf32> to vector<32x128xf32>
    %68 = arith.select %54, %67, %65 : vector<32x128xi1>, vector<32x128xf32>
    %c0_22 = arith.constant 0 : index
    %c0_23 = arith.constant 0 : index
    %69 = vector.load %arg7[%c0_22, %c0_23] : memref<32x128xf32, #tpu.memory_space<vmem>>, vector<32x128xf32>
    tpu.vector_store %arg7[%c0_22, %c0_23], %68 {strides = array<i32>} : memref<32x128xf32, #tpu.memory_space<vmem>>, vector<32x128xf32>,
    return
  }
  func.func @transform_0(%arg0: i32) -> (i32, i32) {
    %c0_i32 = arith.constant 0 : i32
    %c0_i32_0 = arith.constant 0 : i32
    return %arg0, %c0_i32 : i32, i32
  }
  func.func @transform_1(%arg0: i32) -> (i32, i32) {
    %c0_i32 = arith.constant 0 : i32
    %c0_i32_0 = arith.constant 0 : i32
    %c0_i32_1 = arith.constant 0 : i32
    return %c0_i32, %c0_i32_0 : i32, i32
  }
  func.func @transform_2(%arg0: i32) -> (i32, i32) {
    %c0_i32 = arith.constant 0 : i32
    %c0_i32_0 = arith.constant 0 : i32
    %c0_i32_1 = arith.constant 0 : i32
    return %c0_i32, %c0_i32_0 : i32, i32
  }
  func.func @transform_3(%arg0: i32) -> (i32, i32) {
    %c0_i32 = arith.constant 0 : i32
    %c0_i32_0 = arith.constant 0 : i32
    %c0_i32_1 = arith.constant 0 : i32
    return %c0_i32, %c0_i32_0 : i32, i32
  }
  func.func @transform_4(%arg0: i32) -> (i32, i32) {
    %c0_i32 = arith.constant 0 : i32
    %c0_i32_0 = arith.constant 0 : i32
    %c0_i32_1 = arith.constant 0 : i32
    return %c0_i32, %c0_i32_0 : i32, i32
  }
  func.func @transform_5(%arg0: i32) -> (i32, i32) {
    %c0_i32 = arith.constant 0 : i32
    %c0_i32_0 = arith.constant 0 : i32
    return %arg0, %c0_i32 : i32, i32
  }
  func.func @transform_6(%arg0: i32) -> (i32, i32) {
    %c0_i32 = arith.constant 0 : i32
    %c0_i32_0 = arith.constant 0 : i32
    return %arg0, %c0_i32 : i32, i32
  }
}

</mosaic_0001>

<bundles_post_ra>
// kernel: tpu_custom_call.1
= control target key start
LH: loop header
LB: loop body
LE: loop exit
PB: predicated region body
PF: predicated region fallthrough
CT: control target
= control target key end

     0   :  { %11 = vsyncpa [#allocation3], 0  ;;  %s1134_s0 = inlined_call_operand.vmem [shape: f32[64,16], index: 0, kind: input, shape index: {}]   ;;  %s1135_s1 = inlined_call_operand.vmem [shape: f32[16,32], index: 1, kind: input, shape index: {}]   ;;  %s1136_s2 = inlined_call_operand.vmem [shape: f32[1,32], index: 2, kind: input, shape index: {}]   ;;  %s1137_s3 = inlined_call_operand.vmem [shape: f32[2,32], index: 3, kind: input, shape index: {}]   ;;  %s1138_s4 = inlined_call_operand.vmem [shape: f32[1,2], index: 4, kind: input, shape index: {}]   ;;  %s1139_s5 = inlined_call_operand.vmem [shape: f32[64,2], index: 5, kind: input, shape index: {}]   ;;  %s1140_s6 = inlined_call_operand.hbm [shape: f32[64,128], index: 6, kind: output, shape index: {}]  }
   0x1   :  { %13 = vsyncpa [#allocation3 + $0x1], 0  ;;  %s936_s21 = smov 0   ;;  %s938_s22 = smov 0  }
   0x2   :  { %s940_s23 = smov 0   ;;  %s942_s24 = smov 0  }
   0x3 LB: > { %s957_s25 = sadd.s32 4294967295, %s892_s24   ;;  %s712_s26 = sadd.s32 4294967294, %s892_s24   ;;  %s892_s24 = sphi %s942_s24, %s1146_s24   ;;  %s888_s23 = sphi %s940_s23, %s1145_s23   ;;  %s884_s22 = sphi %s938_s22, %s1144_s22   ;;  %s880_s21 = sphi %s936_s21, %s1143_s21  }
   0x4   : > { %s961_s27 = sadd.s32 1, %s892_s24   ;;  %s162_s28 = sadd.s32 1, %s888_s23 }
   0x5   : > { %s159_s29 = ssub.s32 %s892_s24, %s961_s27  ;;  %p172_p0 = scmp.ne.s32.totalorder %s888_s23, %s884_s22 }
   0x6   : > { %p160_p1 = scmp.eq.s32.totalorder %s159_s29, 0  ;;  %p173_p2 = scmp.eq.s32.totalorder %s957_s25, 1 }
   0x7   : > { %p178_p3 = scmp.ne.s32.totalorder %s884_s22, %s880_s21  ;;  %p179_p4 = scmp.eq.s32.totalorder %s712_s26, 1 }
   0x8   : > { %s972_s30 = scalar_select %p160_p1, %s888_s23, %s162_s28  }
   0x9   : > { %p974_p5 = por %p173_p2, %p172_p0  ;;  %p978_p6 = por %p179_p4, %p178_p3 }
   0xa   : > { %p715_p7 = scmp.ge.s32.totalorder %s892_s24, 1  ;;  %p227_p8 = scmp.lt.s32.totalorder %s892_s24, 3 }
   0xc   : > { %p228_p9 = pnand %p715_p7, %p227_p8 }
   0xd   : > { %v279_v0 = vld [vmem:[%s1135_s1] sm:$0xff] (!%p228_p9)  ;;  %v280_v1 = vld [vmem:[%s1135_s1 + $0x8] sm:$0xff] (!%p228_p9)  ;;  %s717_s13 = sshll.u32 (!%p228_p9), %s957_s25, 2  ;;  %vm288_vm0 = vcmask (!%p228_p9), 130048   ;;  %s894_s26 = smov (!%p228_p9), 127   ;;  %v896_v17 = vmov (!%p228_p9), 0   ;;  %v392_v19 = vlaneseq (!%p228_p9) }
   0xe   : > { %231 = sbr.rel (%p228_p9) target bundleno = 580 (0x244), region = 44  ;;  %v749_v2 = vpack.c.bf16 (!%p228_p9), %v280_v1, %v279_v0  ;;  %p263_p10 = scmp.lt.s32.totalorder (!%p228_p9), %s717_s13, 7  ;;  %801 = vset.pattern.permute.xlu1 (!%p228_p9), %v896_v17  ;;  %800 = vset.pattern.permute.xlu0 (!%p228_p9), %v896_v17  ;;  %v721_v18 = vld [vmem:[%s1136_s2] ss:$0 sm:$0xff] (!%p228_p9)  ;;  %vm400_vm1 = vcmask (!%p228_p9), 261120  }
   0xf   : > { %s895_s28 = smov (!%p228_p9), 1   ;;  %v393_v27 = vshrl.u32 (!%p228_p9), %v392_v19, 7  ;;  %v390_v30 = vld [vmem:[%s1137_s3] sm:$0x3] (!%p228_p9)  ;;  %s732_s18 = sshll.u32 (!%p228_p9), %s957_s25, 9 }
  0x10   : > { %750 = vmatprep.subr.bf16.mxu0 (!%p228_p9), %v749_v2  ;;  %753 = vmatprep.subr.bf16.mxu1 (!%p228_p9), %v749_v2  ;;  %s898_s29 = smov (!%p228_p9), [#allocation2]  }
  0x11   : > { %752 = vmatpush3.bf16.msra.mxu0 (!%p228_p9), %v749_v2  ;;  %754 = vmatpush3.bf16.msra.mxu1 (!%p228_p9), %v749_v2  ;;  %v415_v28 = vsub.s32 (!%p228_p9), 1, %v393_v27  ;;  %v394_v31 = vsub.s32 (!%p228_p9), 0, %v393_v27  ;;  %s834_s9 = sshll.u32 (!%p228_p9), %s898_s29, 4  ;;  %s835_s9 = int_to_ptr.vmem [resolvable:$false] %s834_s9 }
  0x12   : > { %s836_s10 = scalar_lea.vmem (!%p228_p9), %s835_s9, 1024 }
  0x13   : > { %v416_v32 = vrot.slane (!%p228_p9), %v390_v30, %v415_v28  ;;  %v395_v34 = vrot.slane (!%p228_p9), %v390_v30, %v394_v31 }
  0x15   : > { %s1148_s13 = smov (!%p263_p10, %s717_s13), 7 }
  0x16   : > { %s718_s14 = sshll.u32 %s1148_s13, 3 }
  0x17   : > { %s266_s17 = scalar_lea.vmem %s1134_s0, %s718_s14  ;;  %s272_s20 = scalar_lea.vmem %s1139_s5, %s718_s14 }
  0x18   : > { %v275_v3 = vld [vmem:[%s266_s17] sm:$0xff]  ;;  %v277_v4 = vld [vmem:[%s266_s17 + $0x10] sm:$0xff]  ;;  %v276_v5 = vld [vmem:[%s266_s17 + $0x8] sm:$0xff]  ;;  %s259_s14 = sand.u32 1, %s884_s22  }
  0x19   : > { %743 = vmatprep.mubr.msk.f32.mxu0 %vm288_vm0, %v275_v3  ;;  %746 = vmatprep.mubr.msk.f32.mxu1 %vm288_vm0, %v277_v4  ;;  %v278_v6 = vld [vmem:[%s266_s17 + $0x18] sm:$0xff]  ;;  %v997_v7 = vld [vmem:[%s272_s20 + $0x8] sm:$0xff]  ;;  %v999_v8 = vld [vmem:[%s272_s20 + $0x10] sm:$0xff]  ;;  %s716_s15 = sshll.u32 %s259_s14, 5  ;;  %s1093_s25 = scalar_lea.sflag [#allocation3], %s259_s14 }
  0x1a   : > { %744 = vmatmul.mubr.msk.f32.vlgmr.msra.gmra.mrb[0].mxu0 %vm288_vm0, %v276_v5  ;;  %747 = vmatmul.mubr.msk.f32.vlgmr.msra.gmra.mrb[0].mxu1 %vm288_vm0, %v278_v6  ;;  %v1003_v9 = vmul.f32 %v997_v7, %v997_v7  ;;  %v1005_v10 = vld [vmem:[%s272_s20] sm:$0xff]  ;;  %v1014_v12 = vmul.f32 %v999_v8, %v999_v8  ;;  %v1017_v13 = vld [vmem:[%s272_s20 + $0x18] sm:$0xff]  ;;  %v476_v16 = vmul.f32 0.2236068, %v997_v7  ;;  %v477_v3 = vmul.f32 0.2236068, %v999_v8 }
  0x1b   : > { %v1009_v11 = vmul.f32 %v1005_v10, %v1005_v10  ;;  %v475_v14 = vmul.f32 0.2236068, %v1005_v10  ;;  %v1023_v15 = vmul.f32 %v1017_v13, %v1017_v13  ;;  %v478_v63 = vmul.f32 0.2236068, %v1017_v13  ;;  %s261_s16 = scalar_lea.vmem [#allocation2], %s716_s15 }
  0x1c   : > { %517 = vrot.lane.b32.xlu1 %v1003_v9, %s894_s26  ;;  %s638_s17 = sshll.u32 %s261_s16, 4  ;;  %s1082_s17 = int_to_ptr.vmem [resolvable:$true] %s638_s17 }
  0x1d   : > { %515 = vrot.lane.b32.xlu0 %v1009_v11, %s894_s26  ;;  %p837_p0 = scmp.lt.s32.totalorder %s1082_s17, %s835_s9 }
  0x20   : > { %519 = vrot.lane.b32.xlu1 %v1014_v12, %s894_s26 }
  0x21   : > { %483 = vrot.lane.b32.xlu0 %v475_v14, %s895_s28 }
  0x24   : > { %521 = vrot.lane.b32.xlu1 %v1023_v15, %s894_s26  ;;  %s1087_s26 = scalar_lea.hbm %s1140_s6, %s732_s18 }
  0x28   : > { %485 = vrot.lane.b32.xlu1 %v476_v16, %s895_s28 }
  0x8e   : > { %v518_v53 = vpop.permute.xlu1 %517 }
  0x8f   : > { %v528_v56 = vadd.f32 %v518_v53, %v1003_v9  ;;  %v516_v57 = vpop.permute.xlu0 %515 }
  0x90   : > { %v527_v58 = vadd.f32 %v516_v57, %v1009_v11 }
  0x91   : > { %v532_v59 = vadd.f32 -3.506558, %v528_v56 }
  0x92   : > { %v520_v55 = vpop.permute.xlu1 %519  ;;  %v531_v62 = vadd.f32 -3.506558, %v527_v58 }
  0x93   : > { %v529_v60 = vadd.f32 %v520_v55, %v1014_v12  ;;  %v536_v0 = vadd.f32 3.675754, %v532_v59  ;;  %v500_v55 = vmul.f32 0.38729835, %v997_v7  ;;  %v499_v59 = vmul.f32 0.38729835, %v1005_v10 }
  0x94   : > { %v535_v4 = vadd.f32 3.675754, %v531_v62 }
  0x95   : > { %v533_v1 = vadd.f32 -3.506558, %v529_v60  ;;  %v540_v5 = vmul.f32 -0.5, %v536_v0 }
  0x96   : > { %v522_v61 = vpop.permute.xlu1 %521  ;;  %v539_v12 = vmul.f32 -0.5, %v535_v4 }
  0x97   : > { %v530_v2 = vadd.f32 %v522_v61, %v1023_v15  ;;  %v537_v6 = vadd.f32 3.675754, %v533_v1  ;;  %v897_v61 = vmov 1   ;;  %v470_v1 = vmul.f32 0.4472136, %v1017_v13 }
  0x99   : > { %v534_v9 = vadd.f32 -3.506558, %v530_v2  ;;  %v541_v11 = vmul.f32 -0.5, %v537_v6 }
  0x9a   : > { %v486_v15 = vpop.permute.xlu1 %485 }
  0x9b   : > { %v538_v14 = vadd.f32 3.675754, %v534_v9 }
  0x9d   : > { %v542_v16 = vmul.f32 -0.5, %v538_v14 }
  0xed   : > { %v745_v20 = vpop.f32.mrb[0].mxu0  ;;  %v748_v21 = vpop.f32.mrb[0].mxu1 }
  0xee   : > { %v373_v22 = vadd.f32 %v745_v20, %v721_v18  ;;  %v383_v23 = vadd.f32 %v748_v21, %v721_v18  ;;  %v377_v24 = vpop.f32.mrb[1].mxu1  ;;  %v367_v25 = vpop.f32.mrb[1].mxu0  ;;  %v726_v20 = vld [vmem:[%s1138_s4] ss:$0 sm:$0xff] }
  0xef   : > { %v368_v26 = vadd.f32 %v721_v18, %v367_v25  ;;  %v378_v29 = vadd.f32 %v721_v18, %v377_v24  ;;  %v484_v18 = vpop.permute.xlu0 %483 }
  0xf0   : > { %806 = vtanh.f32 %v373_v22 }
  0xf1   : > { %808 = vtanh.f32 %v383_v23 }
  0xf2   : > { %810 = vtanh.f32 %v368_v26 }
  0xf3   : > { %812 = vtanh.f32 %v378_v29 }
  0xfa   : > { %v807_v33 = vpop.eup %806 }
  0xfb   : > { %v809_v35 = vpop.eup %808  ;;  %v418_v36 = vmul.f32 %v807_v33, %v416_v32  ;;  %v397_v38 = vmul.f32 %v807_v33, %v395_v34 }
  0xfc   : > { %v420_v37 = vmul.f32 %v809_v35, %v416_v32  ;;  %v811_v39 = vpop.eup %810  ;;  %v399_v47 = vmul.f32 %v809_v35, %v395_v34 }
  0xfd   : > { %v424_v40 = vsel %vm400_vm1, %v418_v36, 0.0  ;;  %v417_v42 = vmul.f32 %v811_v39, %v416_v32  ;;  %v404_v43 = vsel %vm400_vm1, %v397_v38, 0.0  ;;  %v396_v45 = vmul.f32 %v811_v39, %v395_v34  ;;  %v813_v46 = vpop.eup %812 }
  0xfe   : > { %v430_v41 = vsel %vm400_vm1, %v420_v37, 0.0  ;;  %425 = vadd.xlane.f32.xlu0 %v424_v40  ;;  %v398_v49 = vmul.f32 %v813_v46, %v395_v34  ;;  %v410_v50 = vsel %vm400_vm1, %v399_v47, 0.0  ;;  %v419_v51 = vmul.f32 %v813_v46, %v416_v32 }
  0xff   : > { %431 = vadd.xlane.f32.xlu1 %v430_v41  ;;  %v421_v44 = vsel %vm400_vm1, %v417_v42, 0.0  ;;  %v401_v48 = vsel %vm400_vm1, %v396_v45, 0.0  ;;  %v468_v38 = vmul.f32 0.4472136, %v997_v7  ;;  %v467_v45 = vmul.f32 0.4472136, %v1005_v10 }
 0x100   : > { %v407_v52 = vsel %vm400_vm1, %v398_v49, 0.0  ;;  %v427_v54 = vsel %vm400_vm1, %v419_v51, 0.0 }
 0x102   : > { %422 = vadd.xlane.f32.xlu0 %v421_v44 }
 0x103   : > { %405 = vadd.xlane.f32.xlu1 %v404_v43 }
 0x106   : > { %402 = vadd.xlane.f32.xlu0 %v401_v48  ;;  %v502_v48 = vmul.f32 0.38729835, %v1017_v13 }
 0x107   : > { %411 = vadd.xlane.f32.xlu1 %v410_v50 }
 0x10a   : > { %408 = vadd.xlane.f32.xlu0 %v407_v52 }
 0x10b   : > { %428 = vadd.xlane.f32.xlu1 %v427_v54 }
 0x11c   : > { %489 = vrot.lane.b32.xlu1 %v478_v63, %s895_s28 }
 0x120   : > { %487 = vrot.lane.b32.xlu0 %v477_v3, %s895_s28  ;;  %555 = vperm.xlu1 %801, %v540_v5   ;;  %v501_v3 = vmul.f32 0.38729835, %v999_v8  ;;  %s830_s28 = scalar_lea.vmem %s1082_s17, 512 }
 0x121   : > { %p831_p11 = scmp.ne.s32.totalorder %s1082_s17, %s830_s28  ;;  %p838_p1 = scmp.lt.s32.totalorder %s836_s10, %s830_s28 }
 0x123   : > { %p832_p12 = pnand %p831_p11, %p974_p5  ;;  %p839_p2 = por %p838_p1, %p837_p0 }
 0x124   : > { %560 = vperm.xlu1 %801, %v541_v11   ;;  %550 = vperm.xlu0 %800, %v539_v12   ;;  %v469_v11 = vmul.f32 0.4472136, %v999_v8 }
 0x125   : > { %p833_p13 = pneg %p832_p12 }
 0x127   : > { %p840_p3 = pnand %p839_p2, %p833_p13 }
 0x128   : > { %565 = vperm.xlu0 %800, %v542_v16  }
 0x18b   : > { %v426_v21 = vpop.xlane.xlu0 %425 }
 0x18c   : > { %v432_v22 = vpop.xlane.xlu1 %431  ;;  %v452_v24 = vadd.f32 %v726_v20, %v426_v21 }
 0x18d   : > { %v454_v23 = vadd.f32 %v726_v20, %v432_v22 }
 0x18f   : > { %v423_v25 = vpop.xlane.xlu0 %422  ;;  %814 = vtanh.f32 %v454_v23 }
 0x190   : > { %v406_v26 = vpop.xlane.xlu1 %405  ;;  %v451_v27 = vadd.f32 %v726_v20, %v423_v25  ;;  %816 = vtanh.f32 %v452_v24 }
 0x191   : > { %v440_v28 = vadd.f32 %v726_v20, %v406_v26 }
 0x193   : > { %818 = vtanh.f32 %v440_v28  ;;  %v403_v29 = vpop.xlane.xlu0 %402 }
 0x194   : > { %820 = vtanh.f32 %v451_v27  ;;  %v412_v30 = vpop.xlane.xlu1 %411  ;;  %v439_v31 = vadd.f32 %v726_v20, %v403_v29 }
 0x195   : > { %v442_v32 = vadd.f32 %v726_v20, %v412_v30 }
 0x196   : > { %822 = vtanh.f32 %v439_v31 }
 0x197   : > { %v409_v36 = vpop.xlane.xlu0 %408 }
 0x198   : > { %v429_v33 = vpop.xlane.xlu1 %428  ;;  %v441_v40 = vadd.f32 %v726_v20, %v409_v36 }
 0x199   : > { %v453_v34 = vadd.f32 %v726_v20, %v429_v33  ;;  %v815_v35 = vpop.eup %814  ;;  %v544_v20 = vand.u32 127, %v392_v19 }
 0x19a   : > { %v817_v37 = vpop.eup %816  ;;  %v462_v41 = vmul.f32 0.5, %v815_v35 }
 0x19b   : > { %824 = vtanh.f32 %v453_v34  ;;  %v460_v47 = vmul.f32 0.5, %v817_v37  ;;  %v488_v63 = vpop.permute.xlu0 %487  ;;  %vm547_vm2 = vcmp.eq.s32.totalorder %v544_v20, 2  ;;  %vm545_vm3 = vcmp.eq.s32.totalorder %v544_v20, 0 }
 0x19c   : > { %826 = vtanh.f32 %v442_v32  ;;  %v490_v44 = vpop.permute.xlu1 %489  ;;  %vm546_vm4 = vcmp.eq.s32.totalorder %v544_v20, 1 }
 0x19d   : > { %v819_v39 = vpop.eup %818  ;;  %828 = vtanh.f32 %v441_v40  ;;  %v498_v52 = vadd.f32 %v490_v44, %v462_v41  ;;  %v496_v54 = vadd.f32 %v486_v15, %v460_v47 }
 0x19e   : > { %v821_v42 = vpop.eup %820  ;;  %v448_v43 = vmul.f32 0.5, %v819_v39 }
 0x19f   : > { %v459_v50 = vmul.f32 0.5, %v821_v42  ;;  %v506_v58 = vadd.f32 %v502_v48, %v498_v52  ;;  %v504_v0 = vadd.f32 %v500_v55, %v496_v54 }
 0x1a0   : > { %v823_v46 = vpop.eup %822  ;;  %v472_v49 = vadd.f32 %v468_v38, %v448_v43  ;;  %v556_v12 = vpop.permute.xlu1 %555 }
 0x1a1   : > { %v447_v51 = vmul.f32 0.5, %v823_v46  ;;  %v495_v57 = vadd.f32 %v484_v18, %v459_v50  ;;  %v569_v8 = vsel %vm547_vm2, %v556_v12, 0.0 }
 0x1a2   : > { %603 = vperm.xlu1 %801, %v472_v49  }
 0x1a3   : > { %v471_v53 = vadd.f32 %v467_v45, %v447_v51  ;;  %v503_v7 = vadd.f32 %v499_v59, %v495_v57  ;;  %v551_v14 = vpop.permute.xlu0 %550 }
 0x1a4   : > { %v561_v16 = vpop.permute.xlu1 %560 }
 0x1a5   : > { %v825_v56 = vpop.eup %824  ;;  %598 = vperm.xlu0 %800, %v471_v53   ;;  %v570_v33 = vsel %vm547_vm2, %v561_v16, 0.0 }
 0x1a6   : > { %v827_v60 = vpop.eup %826  ;;  %803 = vset.pattern.permute.xlu1 %v897_v61  ;;  %v461_v62 = vmul.f32 0.5, %v825_v56 }
 0x1a7   : > { %589 = vperm.xlu1 %803, %v506_v58   ;;  %v450_v2 = vmul.f32 0.5, %v827_v60  ;;  %v829_v5 = vpop.eup %828  ;;  %v566_v18 = vpop.permute.xlu0 %565 }
 0x1a8   : > { %v497_v4 = vadd.f32 %v488_v63, %v461_v62  ;;  %v449_v9 = vmul.f32 0.5, %v829_v5  ;;  %v571_v28 = vsel %vm547_vm2, %v566_v18, 0.0 }
 0x1a9   : > { %802 = vset.pattern.permute.xlu0 %v897_v61  ;;  %v474_v10 = vadd.f32 %v470_v1, %v450_v2 }
 0x1aa   : > { %579 = vperm.xlu0 %802, %v504_v0   ;;  %v505_v6 = vadd.f32 %v501_v3, %v497_v4  ;;  %v473_v13 = vadd.f32 %v469_v11, %v449_v9 }
 0x1ab   : > { %574 = vperm.xlu1 %803, %v503_v7  }
 0x1ae   : > { %805 = vset.pattern.permute.xlu0 %v896_v17 }
 0x1af   : > { %584 = vperm.xlu1 %803, %v505_v6   ;;  %613 = vperm.xlu0 %805, %v474_v10  }
 0x1b3   : > { %804 = vset.pattern.permute.xlu1 %v896_v17  ;;  %v568_v17 = vsel %vm547_vm2, %v551_v14, 0.0 }
 0x1b4   : > { %608 = vperm.xlu1 %804, %v473_v13  }
 0x221   : > { %v604_v15 = vpop.permute.xlu1 %603 }
 0x224   : > { %v599_v21 = vpop.permute.xlu0 %598 }
 0x226   : > { %v590_v22 = vpop.permute.xlu1 %589 }
 0x227   : > { %v595_v29 = vsel %vm546_vm4, %v590_v22, %v571_v28 }
 0x229   : > { %v580_v23 = vpop.permute.xlu0 %579 }
 0x22a   : > { %v575_v24 = vpop.permute.xlu1 %574  ;;  %v593_v25 = vsel %vm546_vm4, %v580_v23, %v569_v8 }
 0x22b   : > { %v592_v26 = vsel %vm546_vm4, %v575_v24, %v568_v17  ;;  %v617_v19 = vsel %vm545_vm3, %v604_v15, %v593_v25 }
 0x22c   : > { %v616_v27 = vsel %vm545_vm3, %v599_v21, %v592_v26  ;;  %621 = vst [vmem:[%s261_s16 + $0x8] sm:$0xff] %v617_v19 }
 0x22d   : > { %620 = vst [vmem:[%s261_s16] sm:$0xff] %v616_v27 }
 0x22e   : > { %v585_v30 = vpop.permute.xlu1 %584  ;;  %v614_v31 = vpop.permute.xlu0 %613 }
 0x22f   : > { %v619_v32 = vsel %vm545_vm3, %v614_v31, %v595_v29  ;;  %v594_v34 = vsel %vm546_vm4, %v585_v30, %v570_v33 }
 0x230   : > { %623 = vst [vmem:[%s261_s16 + $0x18] sm:$0xff] %v619_v32 }
 0x233   : > { %v609_v35 = vpop.permute.xlu1 %608 }
 0x234   : > { %v618_v36 = vsel %vm545_vm3, %v609_v35, %v594_v34 }
 0x235   : > { %622 = vst [vmem:[%s261_s16 + $0x10] sm:$0xff] %v618_v36 }
 0x236   : > { %843 = shalt.err (!%p840_p3)
}
 0x237   : > { %s844_s11 = scalar_lea.hbm %s1087_s26, 512  ;;  %s848_s14 = scalar_lea.hbm %s1140_s6, 1024 }
 0x238   : > { %p845_p4 = scmp.ne.s32.totalorder %s1087_s26, %s844_s11  ;;  %p849_p9 = scmp.lt.u32.totalorder %s1087_s26, %s1140_s6 }
 0x239   : > { %p850_p10 = scmp.lt.u32.totalorder %s848_s14, %s844_s11  ;;  %p852_p12 = scmp.lt.u32.totalorder %s844_s11, %s1087_s26 }
 0x23a   : > { %p846_p7 = pnand %p845_p4, %p974_p5 }
 0x23b   : > { %p851_p11 = por %p850_p10, %p849_p9 }
 0x23c   : > { %p847_p8 = pneg %p846_p7 }
 0x23d   : > { %p853_p13 = por %p852_p12, %p851_p11 }
 0x23f   : > { %p854_p0 = pnand %p853_p13, %p847_p8 }
 0x241   : > { %857 = shalt.err (!%p854_p0)
}
 0x242   : > { %s899_s18 = smov 128   ;;  %s900_s19 = smov 8  }
 0x243   : > { %755 = dma.vmem_to_hbm [thread:$0]  (%p974_p5), %s1082_s17, 512, %s1087_s26, %s1093_s25, %s899_s18, %s899_s18, %s900_s19  }
 0x244 PF: > { %p761_p1 = scmp.ge.s32.totalorder %s892_s24, 2  ;;  %s653_s20 = sand.u32 1, %s880_s21  }
 0x245   : > { %s654_s28 = scalar_lea.sflag [#allocation3], %s653_s20 }
 0x246   : > { %p758_p2 = pnand %p761_p1, %p978_p6 }
 0x248   : > { %875 = dma.done.wait (!%p758_p2), %s654_s28, 512  }
 0x249   : > { %877 = vsyncadd (!%p758_p2), %s654_s28, 4294966784  ;;  %p16_p3 = scmp.ge.s32.totalorder %s961_s27, 4   ;;  %s1143_s21 = smov %s884_s22 }
 0x24a   : > { %s1144_s22 = smov %s888_s23  ;;  %s1145_s23 = smov %s972_s30 }
 0x24b   : > { %s1146_s24 = smov %s961_s27  ;;  %18 = sbr.rel (!%p16_p3) target bundleno = 3 (0x3), region = 82 }
 0x252   :  { %659 = vsyncpa [#allocation3], 1 }
 0x253   :  { %661 = vsyncpa [#allocation3 + $0x1], 1 }

</bundles_post_ra>
